<compile_context>
chip_gen: v6e
topology: v6e:2x2x1
jax: 0.10.0
libtpu: 0.0.40
codegen_flags: <defaults>
</compile_context>

<pallas_src>
import math

import jax
import jax.numpy as jnp
from jax.experimental import pallas as pl
from jax.experimental.pallas import tpu as pltpu


# Tuning constants (per review: 1-4 MiB blocks, per-generation VMEM awareness).
_BLOCK_BYTES = 2 * 1024 * 1024   # target bytes per (in|out) block
_MAX_LANES = 8192                # lane-width target for the folded fast path
_ROW_CAP = 256                   # batch-row block cap in the general path
_MIN_GRID = 4                    # keep a few grid steps (pipelining / megacore)


# ----------------------------------------------------------------------------
# Kernel: out = batch_slab + pert_row   (pert already projected & clipped)
# ----------------------------------------------------------------------------
def _add_pert_kernel(pert_ref, batch_ref, out_ref):
    # pert_ref : (1, W) f32 VMEM, resident (constant index_map -> fetched once)
    # batch_ref: (R, W) VMEM slab of the batch
    out_ref[...] = (batch_ref[...] + pert_ref[...]).astype(out_ref.dtype)


def _compiler_params(dim_sem, block_bytes, pert_bytes):
    # Double-buffered in + out blocks (+ the small resident pert buffer).
    footprint = 4 * block_bytes + 2 * pert_bytes
    kwargs = dict(dimension_semantics=dim_sem)
    if footprint > 12 * 1024 * 1024:
        # Only rare huge-pert_len configs land here; raised limit stays within
        # physical VMEM on v5e/v6e (128 MiB) and v7x (64 MiB).
        kwargs["vmem_limit_bytes"] = int(min(footprint + (4 << 20), 60 << 20))
    return pltpu.CompilerParams(**kwargs)


def apply_perturbation(batch, proj_pert, *, donate_batch=False):
    """out = batch + tile(proj_pert)[:T], computed by one pallas_call.

    `proj_pert` must already be norm-projected / clipped.  Set
    `donate_batch=True` only when the batch buffer is donated at the jit
    boundary (enables input_output_aliases; halves peak HBM footprint).
    """
    squeeze = batch.ndim == 1
    if squeeze:
        batch = batch[None, :]
    B, T = batch.shape
    P = proj_pert.shape[0]
    if T < P:
        raise ValueError(f"audio_len ({T}) must be >= pert_len ({P})")

    itemsize = jnp.dtype(batch.dtype).itemsize
    base = (P * 128) // math.gcd(P, 128)       # lcm(P, 128): lane-dense & phase-aligned
    aliases = {1: 0} if donate_batch else {}

    def tiled_pert(width):
        # Pre-tile the projected perturbation once to the block width (tiny).
        reps = -(-width // P)
        row = jnp.tile(proj_pert.astype(jnp.float32), reps)[:width]
        return row.reshape(1, width)

    # ---- Fold fast path: lane-dense width (multiple of lcm(P,128)) that also
    # ---- divides T, so (B, T) can be row-folded into full-sublane slabs. ----
    W = None
    if base <= T:
        k = max(1, min(_MAX_LANES // base, T // base))
        while k > 1 and T % (base * k):
            k -= 1
        if T % (base * k) == 0:
            W = base * k

    if W is not None:
        rows = B * (T // W)
        # Rows per slab: fill ~_BLOCK_BYTES, but keep >= _MIN_GRID grid steps.
        r_bytes = max(8, ((_BLOCK_BYTES // (W * itemsize)) // 8) * 8)
        r_grid = max(8, ((-(-rows // _MIN_GRID)) // 8) * 8)
        R = min(r_bytes, r_grid)
        if R >= rows:
            R = rows                               # single slab == full rows dim
        batch2 = batch.reshape(rows, W)            # row-major: pure bitcast reshape
        out = pl.pallas_call(
            _add_pert_kernel,
            out_shape=jax.ShapeDtypeStruct((rows, W), batch.dtype),
            grid=(pl.cdiv(rows, R),),
            in_specs=[pl.BlockSpec((1, W), lambda r: (0, 0)),   # resident pert
                      pl.BlockSpec((R, W), lambda r: (r, 0))],  # batch slab
            out_specs=pl.BlockSpec((R, W), lambda r: (r, 0)),
            compiler_params=_compiler_params(
                ("parallel",), R * W * itemsize, W * 4),
            input_output_aliases=aliases,
        )(tiled_pert(W), batch2)
        out = out.reshape(B, T)
        return out[0] if squeeze else out

    # ---- General path: ragged T (masked last time block), 2-D grid. --------
    if base > T:
        # Short clip: one lane-padded block instead of an oversized masked one.
        Wg = (-(-T // 128)) * 128
    else:
        # Lanes per block: ~_BLOCK_BYTES over ~min(B,8) rows, but keep
        # >= _MIN_GRID time steps when T allows it.  Wg is a multiple of P, so
        # every time-block start is phase-aligned with the perturbation.
        row_hint = min(B, 8)
        k_bytes = max(1, _BLOCK_BYTES // (row_hint * base * itemsize))
        k_grid = max(1, -(-T // (base * _MIN_GRID)))
        k_fit = -(-T // base)
        Wg = base * min(k_bytes, k_grid, k_fit)

    # Rows per block: fill up to ~2*_BLOCK_BYTES with the chosen width; tile
    # the batch axis (multiple of 8) when B is large so double-buffering
    # survives on every generation's scoped-VMEM budget.
    rb_fit = max(1, (2 * _BLOCK_BYTES) // (Wg * itemsize))
    if B <= rb_fit or B <= 8:
        Rb = B
    else:
        Rb = min(_ROW_CAP, max(8, (rb_fit // 8) * 8))

    out = pl.pallas_call(
        _add_pert_kernel,
        out_shape=jax.ShapeDtypeStruct((B, T), batch.dtype),
        grid=(pl.cdiv(B, Rb), pl.cdiv(T, Wg)),
        in_specs=[pl.BlockSpec((1, Wg), lambda i, j: (0, 0)),    # resident pert
                  pl.BlockSpec((Rb, Wg), lambda i, j: (i, j))],  # batch block
        out_specs=pl.BlockSpec((Rb, Wg), lambda i, j: (i, j)),
        compiler_params=_compiler_params(
            ("parallel", "parallel"), Rb * Wg * itemsize, Wg * 4),
        input_output_aliases=aliases,
    )(tiled_pert(Wg), batch)
    return out[0] if squeeze else out


# ----------------------------------------------------------------------------
# Module-equivalent wrapper (functional; parameter initialized in-script).
# ----------------------------------------------------------------------------
class PerturbationApplier:
    def __init__(self, pert_len_sec, init_pert_amp=1e-5,
                 init_pert_distribution="uniform", uap_rand_start=False,
                 projection_p=None, clip_val=None, rate=16000, key=None):
        if uap_rand_start:
            raise NotImplementedError("uap_rand_start=True not supported")
        self.rate = rate
        self.pert_len = int(pert_len_sec * rate)
        self.projection_p = projection_p
        self.clip_val = clip_val
        key = jax.random.PRNGKey(0) if key is None else key
        if init_pert_distribution == "uniform":
            pert = jax.random.uniform(key, (self.pert_len,), dtype=jnp.float32)
        elif init_pert_distribution == "normal":
            pert = jax.random.normal(key, (self.pert_len,), dtype=jnp.float32)
        else:
            raise ValueError(init_pert_distribution)
        self.perturbation = (init_pert_amp * pert).astype(jnp.float32)

    def _project(self, pert):
        """project(): norm-projection then clamp (tiny (P,) op, plain JAX)."""
        x = pert.astype(jnp.float32)
        if self.projection_p is not None:
            p = self.projection_p
            if p == 2:
                nrm = jnp.sqrt(jnp.sum(x * x))
            else:
                nrm = jnp.sum(jnp.abs(x) ** p) ** (1.0 / p)
            # F.normalize: x / max(||x||_p, eps); applied only when ||x||_p > 1.
            x = jnp.where(nrm > 1.0, x / jnp.maximum(nrm, 1e-12), x)
        if self.clip_val is not None:
            x = jnp.clip(x, -self.clip_val, self.clip_val)
        return x

    def forward(self, batch):
        if batch.shape[-1] < self.pert_len:
            raise ValueError(
                f"audio_len ({batch.shape[-1]}) must be >= pert_len ({self.pert_len})")
        proj = self._project(self.perturbation)
        # Parity with PyTorch project(): the stored parameter is projected in
        # place; the same projected tensor feeds the kernel (no redundant work).
        self.perturbation = proj
        return apply_perturbation(batch, proj)


# ----------------------------------------------------------------------------
# Pure-JAX reference (for verification only).
# ----------------------------------------------------------------------------
def reference_forward(batch, pert, p, clip_val):
    x = pert.astype(jnp.float32)
    if p is not None:
        if p == 2:
            nrm = jnp.sqrt(jnp.sum(x * x))
        else:
            nrm = jnp.sum(jnp.abs(x) ** p) ** (1.0 / p)
        x = jnp.where(nrm > 1.0, x / jnp.maximum(nrm, 1e-12), x)
    if clip_val is not None:
        x = jnp.clip(x, -clip_val, clip_val)
    T = batch.shape[-1]
    reps = -(-T // x.shape[0])
    tiled = jnp.tile(x, reps)[:T]
    return batch + tiled


if __name__ == "__main__":
    key = jax.random.PRNGKey(0)
    k_pert, k_b1, k_b2, k_b3, k_b4 = jax.random.split(key, 5)
    rate = 16000

    # --- Check 1: folded fast path (T % W == 0 -> sublane-dense slabs) ------
    app1 = PerturbationApplier(256 / rate, init_pert_amp=1.0,
                               init_pert_distribution="uniform",
                               projection_p=2, clip_val=0.05,
                               rate=rate, key=k_pert)            # P = 256
    pert1 = app1.perturbation
    batch1 = jax.random.normal(k_b1, (4, 65536), dtype=jnp.float32)
    out1 = jax.block_until_ready(app1.forward(batch1))
    ref1 = reference_forward(batch1, pert1, 2, 0.05)
    assert out1.shape == batch1.shape and out1.dtype == batch1.dtype
    assert jnp.allclose(out1, ref1, atol=1e-5, rtol=1e-5), "mismatch (fold path)"
    assert float(jnp.max(jnp.abs(app1.perturbation))) <= 0.05 + 1e-6  # in-place project

    # --- Check 2: general ragged-T path (masked last time block) ------------
    app2 = PerturbationApplier(256 / rate, init_pert_amp=1.0,
                               projection_p=2, clip_val=0.05,
                               rate=rate, key=k_pert)
    pert2 = app2.perturbation
    batch2 = jax.random.normal(k_b2, (4, 1152), dtype=jnp.float32)
    out2 = jax.block_until_ready(app2.forward(batch2))
    ref2 = reference_forward(batch2, pert2, 2, 0.05)
    assert jnp.allclose(out2, ref2, atol=1e-5, rtol=1e-5), "mismatch (ragged path)"

    # --- Check 3: pert_len not a multiple of 128 (P = 160), no projection ---
    app3 = PerturbationApplier(0.01, rate=rate, key=k_pert)      # P = 160
    pert3 = app3.perturbation
    batch3 = jax.random.normal(k_b3, (4, 5120), dtype=jnp.float32)
    out3 = jax.block_until_ready(app3.forward(batch3))
    ref3 = reference_forward(batch3, pert3, None, None)
    assert jnp.allclose(out3, ref3, atol=1e-6, rtol=1e-6), "mismatch (P=160 path)"

    # --- Check 4: short clip, T < lcm(P,128), 1-D input (squeeze path) ------
    app4 = PerturbationApplier(0.01, rate=rate, key=k_pert)      # P = 160, base = 640
    pert4 = app4.perturbation
    batch4 = jax.random.normal(k_b4, (512,), dtype=jnp.float32)
    out4 = jax.block_until_ready(app4.forward(batch4))
    ref4 = reference_forward(batch4, pert4, None, None)
    assert out4.shape == (512,)
    assert jnp.allclose(out4, ref4, atol=1e-6, rtol=1e-6), "mismatch (short clip)"

    print("KERNEL_OK")
</pallas_src>

<mosaic_0001>
module attributes {stable_mosaic.version = 11 : i64} {
  func.func @_add_pert_kernel(%arg0: i32, %arg1: memref<1x8192xf32, #tpu.memory_space<vmem>>, %arg2: memref<8x8192xf32, #tpu.memory_space<vmem>>, %arg3: memref<8x8192xf32, #tpu.memory_space<vmem>>) attributes {dimension_semantics = [#tpu.dimension_semantics<parallel>], iteration_bounds = array<i64: 4>, scalar_prefetch = 0 : i64, scratch_operands = 0 : i64, tpu.core_type = #tpu.core_type<tc>, window_params = [{pipeline_mode = #tpu.pipeline_mode<synchronous>, transform_indices = @transform_0, window_bounds = array<i64: 1, 8192>}, {transform_indices = @transform_1, window_bounds = array<i64: 8, 8192>}, {transform_indices = @transform_2, window_bounds = array<i64: 8, 8192>}]} {
    %c0 = arith.constant 0 : index
    %c0_0 = arith.constant 0 : index
    %0 = vector.load %arg2[%c0, %c0_0] : memref<8x8192xf32, #tpu.memory_space<vmem>>, vector<8x8192xf32>
    %c0_1 = arith.constant 0 : index
    %c0_2 = arith.constant 0 : index
    %1 = vector.load %arg1[%c0_1, %c0_2] : memref<1x8192xf32, #tpu.memory_space<vmem>>, vector<1x8192xf32>
    %2 = vector.broadcast %1 : vector<1x8192xf32> to vector<8x8192xf32>
    %3 = arith.addf %0, %2 : vector<8x8192xf32>
    %c0_3 = arith.constant 0 : index
    %c0_4 = arith.constant 0 : index
    %4 = vector.load %arg3[%c0_3, %c0_4] : memref<8x8192xf32, #tpu.memory_space<vmem>>, vector<8x8192xf32>
    tpu.vector_store %arg3[%c0_3, %c0_4], %3 {strides = array<i32>} : memref<8x8192xf32, #tpu.memory_space<vmem>>, vector<8x8192xf32>,
    return
  }
  func.func @transform_0(%arg0: i32) -> (i32, i32) {
    %c0_i32 = arith.constant 0 : i32
    %c0_i32_0 = arith.constant 0 : i32
    %c0_i32_1 = arith.constant 0 : i32
    return %c0_i32, %c0_i32_0 : i32, i32
  }
  func.func @transform_1(%arg0: i32) -> (i32, i32) {
    %c0_i32 = arith.constant 0 : i32
    %c0_i32_0 = arith.constant 0 : i32
    return %arg0, %c0_i32 : i32, i32
  }
  func.func @transform_2(%arg0: i32) -> (i32, i32) {
    %c0_i32 = arith.constant 0 : i32
    %c0_i32_0 = arith.constant 0 : i32
    return %arg0, %c0_i32 : i32, i32
  }
}

</mosaic_0001>

<bundles_post_ra>
// kernel: tpu_custom_call.1
= control target key start
LH: loop header
LB: loop body
LE: loop exit
PB: predicated region body
PF: predicated region fallthrough
CT: control target
= control target key end

     0   :  { %7 = vsyncpa [#allocation3], 0  ;;  %s1408_s0 = inlined_call_operand.hbm [shape: f32[1,8192], index: 0, kind: input, shape index: {}]   ;;  %s1409_s1 = inlined_call_operand.hbm [shape: f32[32,8192], index: 1, kind: input, shape index: {}]   ;;  %s1410_s2 = inlined_call_operand.hbm [shape: f32[32,8192], index: 2, kind: output, shape index: {}]  }
   0x1   :  { %8 = vsyncpa [#allocation6], 0 }
   0x2   :  { %10 = vsyncpa [#allocation6 + $0x1], 0 }
   0x3   :  { %11 = vsyncpa [#allocation4], 0 }
   0x4   :  { %13 = vsyncpa [#allocation4 + $0x1], 0  ;;  %s1015_s9 = smov 0   ;;  %s1017_s10 = smov 0  }
   0x5   :  { %s1019_s11 = smov 0   ;;  %s1021_s12 = smov 0  }
   0x6 LB: > { %s1036_s13 = sadd.s32 4294967295, %s995_s12   ;;  %s798_s14 = sadd.s32 4294967294, %s995_s12   ;;  %s995_s12 = sphi %s1021_s12, %s1432_s12   ;;  %s991_s11 = sphi %s1019_s11, %s1431_s11   ;;  %s987_s10 = sphi %s1017_s10, %s1430_s10   ;;  %s983_s9 = sphi %s1015_s9, %s1429_s9  }
   0x7   : > { %p60_p0 = scmp.ne.s32.totalorder %s987_s10, %s983_s9  ;;  %p1411_p1 = scmp.eq.s32.totalorder %s1036_s13, 0 }
   0x8   : > { %p90_p3 = scmp.eq.s32.totalorder %s798_s14, 3  ;;  %p799_p5 = scmp.ge.s32.totalorder %s995_s12, 1 }
   0x9   : > { %p1045_p4 = por %p1411_p1, %p60_p0  ;;  %p97_p7 = scmp.lt.s32.totalorder %s995_s12, 5 }
   0xa   : > { %p1050_p6 = por %p90_p3, %p60_p0  ;;  %s997_s18 = smov [#allocation2]  }
   0xb   : > { %s1415_s15 = scalar_select %p1045_p4, 1, 0 }
   0xc   : > { %s1416_s16 = scalar_select %p1050_p6, 1, 0 }
   0xd   : > { %p1055_p8 = pnand %p799_p5, %p97_p7  ;;  %s110_s19 = sshll.u32 %s997_s18, 4  ;;  %s111_s19 = int_to_ptr.vmem [resolvable:$true] %s110_s19 }
   0xe   : > { %s1062_s20 = sadd.s32 1, %s995_s12   ;;  %s47_s24 = sadd.s32 1, %s991_s11 }
   0xf   : > { %s1417_s17 = scalar_select %p1055_p8, 1, 0 }
  0x10   : > { %p824_p9 = pneg %p1055_p8  ;;  %s44_s22 = ssub.s32 %s995_s12, %s1062_s20 }
  0x11   : > { %p1072_p11 = scmp.eq.s32.totalorder %s44_s22, 0  ;;  %p54_p12 = scmp.ne.s32.totalorder %s991_s11, %s987_s10 }
  0x12   : > { %p1066_p10 = pnand %p824_p9, %p1411_p1  ;;  %s884_s25 = scalar_lea.vmem %s111_s19, 1024 }
  0x13   : > { %p885_p0 = scmp.ne.s32.totalorder %s111_s19, %s884_s25  ;;  %p892_p7 = scmp.lt.s32.totalorder %s111_s19, %s111_s19 }
  0x14   : > { %p875_p13 = pneg %p1066_p10  ;;  %p893_p2 = scmp.lt.s32.totalorder %s884_s25, %s884_s25 }
  0x16   : > { %p887_p3 = pnand %p885_p0, %p875_p13  ;;  %p894_p9 = por %p893_p2, %p892_p7 }
  0x18   : > { %p888_p5 = pneg %p887_p3 }
  0x1a   : > { %p895_p1 = pnand %p894_p9, %p888_p5 }
  0x1c   : > { %898 = shalt.err (!%p895_p1)
}
  0x1d   : > { %827 = dma.hbm_to_vmem [thread:$0]  (!%p1066_p10), %s1408_s0, 1024, %s111_s19, [#allocation3]  }
  0x1e   : > { %s1089_s28 = scalar_select %p1072_p11, %s991_s11, %s47_s24  }
  0x1f   : > { %p55_p1 = scmp.eq.s32.totalorder %s995_s12, 0  ;;  %p1420_p2 = scmp.eq.s32.totalorder %s1036_s13, 3 }
  0x20   : > { %p837_p0 = scmp.lt.s32.totalorder %s995_s12, 4  ;;  %s121_s30 = sand.u32 1, %s991_s11  }
  0x21   : > { %p1097_p13 = por %p1420_p2, %p54_p12  ;;  %p56_p3 = por %p55_p1, %p54_p12 }
  0x22   : > { %s802_s3 = sshll.u32 %s121_s30, 9  ;;  %s814_s4 = sshll.u32 %s995_s12, 13 }
  0x23   : > { %s1421_s29 = scalar_select %p1097_p13, 1, 0 }
  0x24   : > { %s1110_s7 = scalar_lea.hbm %s1409_s1, %s814_s4  ;;  %s125_s8 = scalar_lea.vmem [#allocation5], %s802_s3 }
  0x25   : > { %s133_s14 = sshll.u32 %s125_s8, 4  ;;  %p1112_p10 = pnand %p837_p0, %p56_p3  ;;  %s134_s14 = int_to_ptr.vmem [resolvable:$true] %s133_s14 }
  0x26   : > { %s122_s19 = scalar_lea.sflag [#allocation6], %s121_s30  ;;  %s899_s21 = scalar_lea.hbm %s1110_s7, 8192 }
  0x27   : > { %p900_p11 = scmp.ne.s32.totalorder %s1110_s7, %s899_s21  ;;  %p901_p12 = pneg %p1112_p10 }
  0x28   : > { %s904_s24 = scalar_lea.hbm %s1409_s1, 32768  ;;  %p905_p9 = scmp.lt.s32.totalorder %s1110_s7, %s1409_s1 }
  0x29   : > { %p902_p5 = pnand %p901_p12, %p900_p11  ;;  %p906_p1 = scmp.lt.s32.totalorder %s904_s24, %s899_s21 }
  0x2b   : > { %p903_p7 = pneg %p902_p5  ;;  %p907_p2 = por %p906_p1, %p905_p9 }
  0x2d   : > { %p908_p0 = pnand %p907_p2, %p903_p7 }
  0x2f   : > { %911 = shalt.err (!%p908_p0)
}
  0x30   : > { %s912_s27 = scalar_lea.vmem %s134_s14, 8192  ;;  %s998_s30 = smov [#allocation5]  }
  0x31   : > { %p913_p3 = scmp.ne.s32.totalorder %s134_s14, %s912_s27  ;;  %s917_s3 = sshll.u32 %s998_s30, 4  ;;  %s918_s3 = int_to_ptr.vmem [resolvable:$false] %s917_s3 }
  0x32   : > { %s919_s4 = scalar_lea.vmem %s918_s3, 16384  ;;  %p920_p11 = scmp.lt.s32.totalorder %s134_s14, %s918_s3 }
  0x33   : > { %p915_p6 = pnand %p913_p3, %p901_p12  ;;  %p921_p5 = scmp.lt.s32.totalorder %s919_s4, %s912_s27 }
  0x35   : > { %p916_p13 = pneg %p915_p6  ;;  %p922_p4 = por %p921_p5, %p920_p11 }
  0x37   : > { %p923_p8 = pnand %p922_p4, %p916_p13 }
  0x39   : > { %926 = shalt.err (!%p923_p8)
}
  0x3a   : > { %831 = dma.hbm_to_vmem [thread:$0]  (!%p1112_p10), %s1110_s7, 8192, %s134_s14, %s122_s19  }
  0x3b   : > { %p1423_p7 = scmp.ne.s32.totalorder %s1417_s17, 0 }
  0x3c   : > { %p1424_p9 = scmp.eq.s32.totalorder (!%p1423_p7), %s1036_s13, 0 }
  0x3d   : > { %142 = sbr.rel (%p1423_p7) target bundleno = 131 (0x83), region = 28 }
  0x42   : > { %970 = dma.done.wait (%p1424_p9), [#allocation3], 1024   ;;  %p1425_p6 = pmov %p1424_p9 }
  0x43   : > { %s1137_s5 = sand.u32 1, %s987_s10   ;;  %p1426_p4 = scmp.ne.s32.totalorder %s1415_s15, 0 }
  0x44   : > { %972 = vsyncadd (%p1425_p6), [#allocation3], 4294966272  ;;  %s807_s6 = sshll.u32 %s1137_s5, 9  ;;  %s149_s8 = scalar_lea.sflag [#allocation6], %s1137_s5 }
  0x45   : > { %s1143_s7 = scalar_lea.vmem [#allocation5], %s807_s6 }
  0x46   : > { %974 = dma.done.wait (%p1426_p4), %s149_s8, 8192  }
  0x47   : > { %976 = vsyncadd (%p1426_p4), %s149_s8, 4294959104  ;;  %v253_v0 = vlaneseq  ;;  %v173_v10 = vld [vmem:[%s1143_s7] sm:$0xff]  ;;  %v174_v12 = vld [vmem:[%s1143_s7 + $0x8] sm:$0xff]  ;;  %s1188_s15 = scalar_lea.vmem [#allocation7], %s807_s6  ;;  %s815_s17 = sshll.u32 %s1036_s13, 13 }
  0x48   : > { %v237_v11 = vld [vmem:[#allocation2] sm:$0xff]  ;;  %v175_v15 = vld [vmem:[%s1143_s7 + $0x10] sm:$0xff]  ;;  %v176_v17 = vld [vmem:[%s1143_s7 + $0x18] sm:$0xff]  ;;  %s716_s14 = sshll.u32 %s1188_s15, 4  ;;  %s1358_s19 = scalar_lea.hbm %s1410_s2, %s815_s17  ;;  %s1360_s14 = int_to_ptr.vmem [resolvable:$true] %s716_s14 }
  0x49   : > { %v254_v1 = vshrl.u32 %v253_v0, 7  ;;  %v177_v19 = vld [vmem:[%s1143_s7 + $0x20] sm:$0xff]  ;;  %v178_v21 = vld [vmem:[%s1143_s7 + $0x28] sm:$0xff]  ;;  %v179_v23 = vld [vmem:[%s1143_s7 + $0x30] sm:$0xff]  ;;  %s702_s21 = scalar_lea.sflag [#allocation4], %s1137_s5  ;;  %s927_s22 = scalar_lea.vmem %s1360_s14, 8192 }
  0x4a   : > { %v180_v25 = vld [vmem:[%s1143_s7 + $0x38] sm:$0xff]  ;;  %v181_v31 = vld [vmem:[%s1143_s7 + $0x40] sm:$0xff]  ;;  %v238_v32 = vld [vmem:[#allocation2 + $0x8] sm:$0xff]  ;;  %p928_p8 = scmp.ne.s32.totalorder %s1360_s14, %s927_s22  ;;  %p1427_p13 = scmp.ne.s32.totalorder %s1421_s29, 0 }
  0x4b   : > { %v1149_v2 = vsub.s32 0, %v254_v1  ;;  %v1151_v3 = vsub.s32 1, %v254_v1  ;;  %v1153_v4 = vsub.s32 2, %v254_v1  ;;  %v1155_v5 = vsub.s32 3, %v254_v1  ;;  %v182_v33 = vld [vmem:[%s1143_s7 + $0x48] sm:$0xff]  ;;  %v183_v38 = vld [vmem:[%s1143_s7 + $0x50] sm:$0xff] }
  0x4c   : > { %v1157_v6 = vsub.s32 4, %v254_v1  ;;  %v1159_v7 = vsub.s32 5, %v254_v1  ;;  %v1161_v8 = vsub.s32 6, %v254_v1  ;;  %v1163_v9 = vsub.s32 7, %v254_v1  ;;  %v184_v39 = vld [vmem:[%s1143_s7 + $0x58] sm:$0xff]  ;;  %v185_v40 = vld [vmem:[%s1143_s7 + $0x60] sm:$0xff]  ;;  %p929_p10 = pnand %p928_p8, %p1427_p13 }
  0x4d   : > { %v256_v13 = vrot.slane %v237_v11, %v1149_v2  ;;  %v260_v14 = vrot.slane %v237_v11, %v1151_v3  ;;  %v264_v16 = vrot.slane %v237_v11, %v1153_v4  ;;  %v268_v18 = vrot.slane %v237_v11, %v1155_v5  ;;  %v186_v45 = vld [vmem:[%s1143_s7 + $0x68] sm:$0xff]  ;;  %v187_v46 = vld [vmem:[%s1143_s7 + $0x70] sm:$0xff]  ;;  %v188_v47 = vld [vmem:[%s1143_s7 + $0x78] sm:$0xff]  ;;  %s999_s23 = smov [#allocation7]  }
  0x4e   : > { %v272_v20 = vrot.slane %v237_v11, %v1157_v6  ;;  %v276_v22 = vrot.slane %v237_v11, %v1159_v7  ;;  %v280_v24 = vrot.slane %v237_v11, %v1161_v8  ;;  %v284_v26 = vrot.slane %v237_v11, %v1163_v9  ;;  %v239_v52 = vld [vmem:[#allocation2 + $0x10] sm:$0xff]  ;;  %v189_v57 = vld [vmem:[%s1143_s7 + $0x80] sm:$0xff]  ;;  %v190_v58 = vld [vmem:[%s1143_s7 + $0x88] sm:$0xff]  ;;  %p930_p12 = pneg %p929_p10  ;;  %s931_s24 = sshll.u32 %s999_s23, 4  ;;  %s932_s24 = int_to_ptr.vmem [resolvable:$false] %s931_s24 }
  0x4f   : > { %v573_v27 = vadd.f32 %v256_v13, %v173_v10  ;;  %v574_v28 = vadd.f32 %v260_v14, %v174_v12  ;;  %v575_v29 = vadd.f32 %v264_v16, %v175_v15  ;;  %v576_v30 = vadd.f32 %v268_v18, %v176_v17  ;;  %v191_v63 = vld [vmem:[%s1143_s7 + $0x90] sm:$0xff]  ;;  %v192_v0 = vld [vmem:[%s1143_s7 + $0x98] sm:$0xff]  ;;  %v193_v1 = vld [vmem:[%s1143_s7 + $0xa0] sm:$0xff]  ;;  %s933_s25 = scalar_lea.vmem %s932_s24, 16384  ;;  %p934_p1 = scmp.lt.s32.totalorder %s1360_s14, %s932_s24 }
  0x50   : > { %v577_v34 = vadd.f32 %v272_v20, %v177_v19  ;;  %v578_v35 = vadd.f32 %v276_v22, %v178_v21  ;;  %v579_v36 = vadd.f32 %v280_v24, %v179_v23  ;;  %v580_v37 = vadd.f32 %v284_v26, %v180_v25  ;;  %v194_v14 = vld [vmem:[%s1143_s7 + $0xa8] sm:$0xff]  ;;  %v195_v15 = vld [vmem:[%s1143_s7 + $0xb0] sm:$0xff]  ;;  %v196_v16 = vld [vmem:[%s1143_s7 + $0xb8] sm:$0xff]  ;;  %p935_p2 = scmp.lt.s32.totalorder %s933_s25, %s927_s22 }
  0x51   : > { %637 = vst [vmem:[%s1188_s15] sm:$0xff] %v573_v27  ;;  %638 = vst [vmem:[%s1188_s15 + $0x8] sm:$0xff] %v574_v28  ;;  %v288_v41 = vrot.slane %v238_v32, %v1149_v2  ;;  %v292_v42 = vrot.slane %v238_v32, %v1151_v3  ;;  %v296_v43 = vrot.slane %v238_v32, %v1153_v4  ;;  %v240_v21 = vld [vmem:[#allocation2 + $0x18] sm:$0xff]  ;;  %v197_v26 = vld [vmem:[%s1143_s7 + $0xc0] sm:$0xff] }
  0x52   : > { %639 = vst [vmem:[%s1188_s15 + $0x10] sm:$0xff] %v575_v29  ;;  %640 = vst [vmem:[%s1188_s15 + $0x18] sm:$0xff] %v576_v30  ;;  %v300_v44 = vrot.slane %v238_v32, %v1155_v5  ;;  %v304_v48 = vrot.slane %v238_v32, %v1157_v6  ;;  %v308_v49 = vrot.slane %v238_v32, %v1159_v7  ;;  %v198_v27 = vld [vmem:[%s1143_s7 + $0xc8] sm:$0xff]  ;;  %p936_p0 = por %p935_p2, %p934_p1 }
  0x53   : > { %641 = vst [vmem:[%s1188_s15 + $0x20] sm:$0xff] %v577_v34  ;;  %642 = vst [vmem:[%s1188_s15 + $0x28] sm:$0xff] %v578_v35  ;;  %v312_v50 = vrot.slane %v238_v32, %v1161_v8  ;;  %v316_v51 = vrot.slane %v238_v32, %v1163_v9  ;;  %v581_v53 = vadd.f32 %v288_v41, %v181_v31  ;;  %v199_v32 = vld [vmem:[%s1143_s7 + $0xd0] sm:$0xff]  ;;  %v201_v34 = vld [vmem:[%s1143_s7 + $0xe0] sm:$0xff] }
  0x54   : > { %643 = vst [vmem:[%s1188_s15 + $0x30] sm:$0xff] %v579_v36  ;;  %644 = vst [vmem:[%s1188_s15 + $0x38] sm:$0xff] %v580_v37  ;;  %v582_v54 = vadd.f32 %v292_v42, %v182_v33  ;;  %v583_v55 = vadd.f32 %v296_v43, %v183_v38  ;;  %v584_v56 = vadd.f32 %v300_v44, %v184_v39  ;;  %v200_v33 = vld [vmem:[%s1143_s7 + $0xd8] sm:$0xff]  ;;  %v202_v39 = vld [vmem:[%s1143_s7 + $0xe8] sm:$0xff]  ;;  %p937_p3 = pnand %p936_p0, %p930_p12 }
  0x55   : > { %v585_v59 = vadd.f32 %v304_v48, %v185_v40  ;;  %v586_v60 = vadd.f32 %v308_v49, %v186_v45  ;;  %v587_v61 = vadd.f32 %v312_v50, %v187_v46  ;;  %v588_v62 = vadd.f32 %v316_v51, %v188_v47  ;;  %645 = vst [vmem:[%s1188_s15 + $0x40] sm:$0xff] %v581_v53  ;;  %v203_v40 = vld [vmem:[%s1143_s7 + $0xf0] sm:$0xff]  ;;  %v204_v41 = vld [vmem:[%s1143_s7 + $0xf8] sm:$0xff]  ;;  %v241_v46 = vld [vmem:[#allocation2 + $0x20] sm:$0xff] }
  0x56   : > { %646 = vst [vmem:[%s1188_s15 + $0x48] sm:$0xff] %v582_v54  ;;  %647 = vst [vmem:[%s1188_s15 + $0x50] sm:$0xff] %v583_v55  ;;  %v320_v10 = vrot.slane %v239_v52, %v1149_v2  ;;  %v324_v11 = vrot.slane %v239_v52, %v1151_v3  ;;  %v328_v12 = vrot.slane %v239_v52, %v1153_v4  ;;  %v205_v51 = vld [vmem:[%s1143_s7 + $0x100] sm:$0xff] }
  0x57   : > { %648 = vst [vmem:[%s1188_s15 + $0x58] sm:$0xff] %v584_v56  ;;  %v332_v13 = vrot.slane %v239_v52, %v1155_v5  ;;  %649 = vst [vmem:[%s1188_s15 + $0x60] sm:$0xff] %v585_v59  ;;  %v336_v17 = vrot.slane %v239_v52, %v1157_v6  ;;  %v340_v18 = vrot.slane %v239_v52, %v1159_v7  ;;  %v209_v59 = vld [vmem:[%s1143_s7 + $0x120] sm:$0xff] }
  0x58   : > { %650 = vst [vmem:[%s1188_s15 + $0x68] sm:$0xff] %v586_v60  ;;  %651 = vst [vmem:[%s1188_s15 + $0x70] sm:$0xff] %v587_v61  ;;  %v344_v19 = vrot.slane %v239_v52, %v1161_v8  ;;  %v348_v20 = vrot.slane %v239_v52, %v1163_v9  ;;  %v589_v22 = vadd.f32 %v320_v10, %v189_v57  ;;  %v206_v52 = vld [vmem:[%s1143_s7 + $0x108] sm:$0xff]  ;;  %v207_v57 = vld [vmem:[%s1143_s7 + $0x110] sm:$0xff] }
  0x59   : > { %652 = vst [vmem:[%s1188_s15 + $0x78] sm:$0xff] %v588_v62  ;;  %v590_v23 = vadd.f32 %v324_v11, %v190_v58  ;;  %v591_v24 = vadd.f32 %v328_v12, %v191_v63  ;;  %v592_v25 = vadd.f32 %v332_v13, %v192_v0  ;;  %v593_v28 = vadd.f32 %v336_v17, %v193_v1  ;;  %v208_v58 = vld [vmem:[%s1143_s7 + $0x118] sm:$0xff]  ;;  %v210_v0 = vld [vmem:[%s1143_s7 + $0x128] sm:$0xff]  ;;  %v211_v1 = vld [vmem:[%s1143_s7 + $0x130] sm:$0xff] }
  0x5a   : > { %v594_v29 = vadd.f32 %v340_v18, %v194_v14  ;;  %v595_v30 = vadd.f32 %v344_v19, %v195_v15  ;;  %v596_v31 = vadd.f32 %v348_v20, %v196_v16  ;;  %653 = vst [vmem:[%s1188_s15 + $0x80] sm:$0xff] %v589_v22  ;;  %v352_v35 = vrot.slane %v240_v21, %v1149_v2  ;;  %v212_v10 = vld [vmem:[%s1143_s7 + $0x138] sm:$0xff]  ;;  %v242_v15 = vld [vmem:[#allocation2 + $0x28] sm:$0xff]  ;;  %v213_v20 = vld [vmem:[%s1143_s7 + $0x140] sm:$0xff] }
  0x5b   : > { %654 = vst [vmem:[%s1188_s15 + $0x88] sm:$0xff] %v590_v23  ;;  %655 = vst [vmem:[%s1188_s15 + $0x90] sm:$0xff] %v591_v24  ;;  %v356_v36 = vrot.slane %v240_v21, %v1151_v3  ;;  %v360_v37 = vrot.slane %v240_v21, %v1153_v4  ;;  %v364_v38 = vrot.slane %v240_v21, %v1155_v5 }
  0x5c   : > { %656 = vst [vmem:[%s1188_s15 + $0x98] sm:$0xff] %v592_v25  ;;  %657 = vst [vmem:[%s1188_s15 + $0xa0] sm:$0xff] %v593_v28  ;;  %v368_v42 = vrot.slane %v240_v21, %v1157_v6  ;;  %v372_v43 = vrot.slane %v240_v21, %v1159_v7  ;;  %v376_v44 = vrot.slane %v240_v21, %v1161_v8  ;;  %v217_v28 = vld [vmem:[%s1143_s7 + $0x160] sm:$0xff] }
  0x5d   : > { %658 = vst [vmem:[%s1188_s15 + $0xa8] sm:$0xff] %v594_v29  ;;  %659 = vst [vmem:[%s1188_s15 + $0xb0] sm:$0xff] %v595_v30  ;;  %v380_v45 = vrot.slane %v240_v21, %v1163_v9  ;;  %v597_v47 = vadd.f32 %v352_v35, %v197_v26  ;;  %v598_v48 = vadd.f32 %v356_v36, %v198_v27  ;;  %v214_v21 = vld [vmem:[%s1143_s7 + $0x148] sm:$0xff]  ;;  %v215_v26 = vld [vmem:[%s1143_s7 + $0x150] sm:$0xff] }
  0x5e   : > { %660 = vst [vmem:[%s1188_s15 + $0xb8] sm:$0xff] %v596_v31  ;;  %v599_v49 = vadd.f32 %v360_v37, %v199_v32  ;;  %v600_v50 = vadd.f32 %v364_v38, %v200_v33  ;;  %v601_v53 = vadd.f32 %v368_v42, %v201_v34  ;;  %v602_v54 = vadd.f32 %v372_v43, %v202_v39  ;;  %v216_v27 = vld [vmem:[%s1143_s7 + $0x158] sm:$0xff]  ;;  %v218_v33 = vld [vmem:[%s1143_s7 + $0x168] sm:$0xff]  ;;  %v219_v34 = vld [vmem:[%s1143_s7 + $0x170] sm:$0xff] }
  0x5f   : > { %v603_v55 = vadd.f32 %v376_v44, %v203_v40  ;;  %v604_v56 = vadd.f32 %v380_v45, %v204_v41  ;;  %661 = vst [vmem:[%s1188_s15 + $0xc0] sm:$0xff] %v597_v47  ;;  %662 = vst [vmem:[%s1188_s15 + $0xc8] sm:$0xff] %v598_v48  ;;  %v384_v60 = vrot.slane %v241_v46, %v1149_v2  ;;  %v220_v35 = vld [vmem:[%s1143_s7 + $0x178] sm:$0xff]  ;;  %v243_v40 = vld [vmem:[#allocation2 + $0x30] sm:$0xff] }
  0x60   : > { %663 = vst [vmem:[%s1188_s15 + $0xd0] sm:$0xff] %v599_v49  ;;  %664 = vst [vmem:[%s1188_s15 + $0xd8] sm:$0xff] %v600_v50  ;;  %v388_v61 = vrot.slane %v241_v46, %v1151_v3  ;;  %v392_v62 = vrot.slane %v241_v46, %v1153_v4  ;;  %v396_v63 = vrot.slane %v241_v46, %v1155_v5  ;;  %v221_v45 = vld [vmem:[%s1143_s7 + $0x180] sm:$0xff] }
  0x61   : > { %665 = vst [vmem:[%s1188_s15 + $0xe0] sm:$0xff] %v601_v53  ;;  %666 = vst [vmem:[%s1188_s15 + $0xe8] sm:$0xff] %v602_v54  ;;  %v400_v11 = vrot.slane %v241_v46, %v1157_v6  ;;  %v404_v12 = vrot.slane %v241_v46, %v1159_v7  ;;  %v408_v13 = vrot.slane %v241_v46, %v1161_v8  ;;  %v225_v53 = vld [vmem:[%s1143_s7 + $0x1a0] sm:$0xff] }
  0x62   : > { %667 = vst [vmem:[%s1188_s15 + $0xf0] sm:$0xff] %v603_v55  ;;  %668 = vst [vmem:[%s1188_s15 + $0xf8] sm:$0xff] %v604_v56  ;;  %v412_v14 = vrot.slane %v241_v46, %v1163_v9  ;;  %v605_v16 = vadd.f32 %v384_v60, %v205_v51  ;;  %v606_v17 = vadd.f32 %v388_v61, %v206_v52  ;;  %v222_v46 = vld [vmem:[%s1143_s7 + $0x188] sm:$0xff]  ;;  %v223_v51 = vld [vmem:[%s1143_s7 + $0x190] sm:$0xff] }
  0x63   : > { %v607_v18 = vadd.f32 %v392_v62, %v207_v57  ;;  %v608_v19 = vadd.f32 %v396_v63, %v208_v58  ;;  %v609_v22 = vadd.f32 %v400_v11, %v209_v59  ;;  %v610_v23 = vadd.f32 %v404_v12, %v210_v0  ;;  %v224_v52 = vld [vmem:[%s1143_s7 + $0x198] sm:$0xff]  ;;  %v226_v58 = vld [vmem:[%s1143_s7 + $0x1a8] sm:$0xff]  ;;  %v227_v59 = vld [vmem:[%s1143_s7 + $0x1b0] sm:$0xff] }
  0x64   : > { %v611_v24 = vadd.f32 %v408_v13, %v211_v1  ;;  %v612_v25 = vadd.f32 %v412_v14, %v212_v10  ;;  %669 = vst [vmem:[%s1188_s15 + $0x100] sm:$0xff] %v605_v16  ;;  %670 = vst [vmem:[%s1188_s15 + $0x108] sm:$0xff] %v606_v17  ;;  %v416_v29 = vrot.slane %v242_v15, %v1149_v2  ;;  %v228_v60 = vld [vmem:[%s1143_s7 + $0x1b8] sm:$0xff]  ;;  %v229_v14 = vld [vmem:[%s1143_s7 + $0x1c0] sm:$0xff] }
  0x65   : > { %671 = vst [vmem:[%s1188_s15 + $0x110] sm:$0xff] %v607_v18  ;;  %672 = vst [vmem:[%s1188_s15 + $0x118] sm:$0xff] %v608_v19  ;;  %v420_v30 = vrot.slane %v242_v15, %v1151_v3  ;;  %v424_v31 = vrot.slane %v242_v15, %v1153_v4  ;;  %v428_v32 = vrot.slane %v242_v15, %v1155_v5  ;;  %v244_v1 = vld [vmem:[#allocation2 + $0x38] sm:$0xff] }
  0x66   : > { %673 = vst [vmem:[%s1188_s15 + $0x120] sm:$0xff] %v609_v22  ;;  %674 = vst [vmem:[%s1188_s15 + $0x128] sm:$0xff] %v610_v23  ;;  %v432_v36 = vrot.slane %v242_v15, %v1157_v6  ;;  %v436_v37 = vrot.slane %v242_v15, %v1159_v7  ;;  %v440_v38 = vrot.slane %v242_v15, %v1161_v8  ;;  %v233_v22 = vld [vmem:[%s1143_s7 + $0x1e0] sm:$0xff] }
  0x67   : > { %675 = vst [vmem:[%s1188_s15 + $0x130] sm:$0xff] %v611_v24  ;;  %676 = vst [vmem:[%s1188_s15 + $0x138] sm:$0xff] %v612_v25  ;;  %v444_v39 = vrot.slane %v242_v15, %v1163_v9  ;;  %v613_v41 = vadd.f32 %v416_v29, %v213_v20  ;;  %v614_v42 = vadd.f32 %v420_v30, %v214_v21  ;;  %v230_v15 = vld [vmem:[%s1143_s7 + $0x1c8] sm:$0xff]  ;;  %v231_v20 = vld [vmem:[%s1143_s7 + $0x1d0] sm:$0xff] }
  0x68   : > { %v615_v43 = vadd.f32 %v424_v31, %v215_v26  ;;  %v616_v44 = vadd.f32 %v428_v32, %v216_v27  ;;  %v617_v47 = vadd.f32 %v432_v36, %v217_v28  ;;  %v618_v48 = vadd.f32 %v436_v37, %v218_v33  ;;  %v232_v21 = vld [vmem:[%s1143_s7 + $0x1d8] sm:$0xff]  ;;  %v234_v27 = vld [vmem:[%s1143_s7 + $0x1e8] sm:$0xff]  ;;  %v235_v28 = vld [vmem:[%s1143_s7 + $0x1f0] sm:$0xff] }
  0x69   : > { %v619_v49 = vadd.f32 %v440_v38, %v219_v34  ;;  %v620_v50 = vadd.f32 %v444_v39, %v220_v35  ;;  %677 = vst [vmem:[%s1188_s15 + $0x140] sm:$0xff] %v613_v41  ;;  %678 = vst [vmem:[%s1188_s15 + $0x148] sm:$0xff] %v614_v42  ;;  %v448_v54 = vrot.slane %v243_v40, %v1149_v2  ;;  %v236_v29 = vld [vmem:[%s1143_s7 + $0x1f8] sm:$0xff] }
  0x6a   : > { %679 = vst [vmem:[%s1188_s15 + $0x150] sm:$0xff] %v615_v43  ;;  %680 = vst [vmem:[%s1188_s15 + $0x158] sm:$0xff] %v616_v44  ;;  %v452_v55 = vrot.slane %v243_v40, %v1151_v3  ;;  %v456_v56 = vrot.slane %v243_v40, %v1153_v4  ;;  %v460_v57 = vrot.slane %v243_v40, %v1155_v5 }
  0x6b   : > { %681 = vst [vmem:[%s1188_s15 + $0x160] sm:$0xff] %v617_v47  ;;  %682 = vst [vmem:[%s1188_s15 + $0x168] sm:$0xff] %v618_v48  ;;  %v464_v61 = vrot.slane %v243_v40, %v1157_v6  ;;  %v468_v62 = vrot.slane %v243_v40, %v1159_v7  ;;  %v472_v63 = vrot.slane %v243_v40, %v1161_v8 }
  0x6c   : > { %683 = vst [vmem:[%s1188_s15 + $0x170] sm:$0xff] %v619_v49  ;;  %684 = vst [vmem:[%s1188_s15 + $0x178] sm:$0xff] %v620_v50  ;;  %v476_v0 = vrot.slane %v243_v40, %v1163_v9  ;;  %v621_v10 = vadd.f32 %v448_v54, %v221_v45  ;;  %v622_v11 = vadd.f32 %v452_v55, %v222_v46 }
  0x6d   : > { %v623_v12 = vadd.f32 %v456_v56, %v223_v51  ;;  %v624_v13 = vadd.f32 %v460_v57, %v224_v52  ;;  %v625_v16 = vadd.f32 %v464_v61, %v225_v53  ;;  %v626_v17 = vadd.f32 %v468_v62, %v226_v58 }
  0x6e   : > { %v627_v18 = vadd.f32 %v472_v63, %v227_v59  ;;  %v628_v19 = vadd.f32 %v476_v0, %v228_v60  ;;  %685 = vst [vmem:[%s1188_s15 + $0x180] sm:$0xff] %v621_v10  ;;  %686 = vst [vmem:[%s1188_s15 + $0x188] sm:$0xff] %v622_v11  ;;  %v480_v23 = vrot.slane %v244_v1, %v1149_v2 }
  0x6f   : > { %687 = vst [vmem:[%s1188_s15 + $0x190] sm:$0xff] %v623_v12  ;;  %688 = vst [vmem:[%s1188_s15 + $0x198] sm:$0xff] %v624_v13  ;;  %v484_v24 = vrot.slane %v244_v1, %v1151_v3  ;;  %v488_v25 = vrot.slane %v244_v1, %v1153_v4  ;;  %v492_v26 = vrot.slane %v244_v1, %v1155_v5 }
  0x70   : > { %689 = vst [vmem:[%s1188_s15 + $0x1a0] sm:$0xff] %v625_v16  ;;  %690 = vst [vmem:[%s1188_s15 + $0x1a8] sm:$0xff] %v626_v17  ;;  %v496_v30 = vrot.slane %v244_v1, %v1157_v6  ;;  %v500_v2 = vrot.slane %v244_v1, %v1159_v7  ;;  %v504_v3 = vrot.slane %v244_v1, %v1161_v8 }
  0x71   : > { %691 = vst [vmem:[%s1188_s15 + $0x1b0] sm:$0xff] %v627_v18  ;;  %692 = vst [vmem:[%s1188_s15 + $0x1b8] sm:$0xff] %v628_v19  ;;  %v508_v4 = vrot.slane %v244_v1, %v1163_v9  ;;  %v629_v5 = vadd.f32 %v480_v23, %v229_v14  ;;  %v630_v31 = vadd.f32 %v484_v24, %v230_v15 }
  0x72   : > { %v631_v32 = vadd.f32 %v488_v25, %v231_v20  ;;  %v632_v33 = vadd.f32 %v492_v26, %v232_v21  ;;  %v633_v34 = vadd.f32 %v496_v30, %v233_v22  ;;  %v634_v35 = vadd.f32 %v500_v2, %v234_v27 }
  0x73   : > { %v635_v6 = vadd.f32 %v504_v3, %v235_v28  ;;  %v636_v36 = vadd.f32 %v508_v4, %v236_v29  ;;  %693 = vst [vmem:[%s1188_s15 + $0x1c0] sm:$0xff] %v629_v5  ;;  %694 = vst [vmem:[%s1188_s15 + $0x1c8] sm:$0xff] %v630_v31 }
  0x74   : > { %695 = vst [vmem:[%s1188_s15 + $0x1d0] sm:$0xff] %v631_v32  ;;  %696 = vst [vmem:[%s1188_s15 + $0x1d8] sm:$0xff] %v632_v33 }
  0x75   : > { %697 = vst [vmem:[%s1188_s15 + $0x1e0] sm:$0xff] %v633_v34  ;;  %698 = vst [vmem:[%s1188_s15 + $0x1e8] sm:$0xff] %v634_v35 }
  0x76   : > { %699 = vst [vmem:[%s1188_s15 + $0x1f0] sm:$0xff] %v635_v6  ;;  %700 = vst [vmem:[%s1188_s15 + $0x1f8] sm:$0xff] %v636_v36 }
  0x77   : > { %940 = shalt.err (!%p937_p3)
}
  0x78   : > { %s941_s26 = scalar_lea.hbm %s1358_s19, 8192  ;;  %s945_s3 = scalar_lea.hbm %s1410_s2, 32768 }
  0x79   : > { %p942_p11 = scmp.ne.s32.totalorder %s1358_s19, %s941_s26  ;;  %p946_p9 = scmp.lt.s32.totalorder %s1358_s19, %s1410_s2 }
  0x7a   : > { %p947_p6 = scmp.lt.s32.totalorder %s945_s3, %s941_s26 }
  0x7b   : > { %p943_p5 = pnand %p942_p11, %p1427_p13 }
  0x7c   : > { %p948_p4 = por %p947_p6, %p946_p9 }
  0x7d   : > { %p944_p7 = pneg %p943_p5 }
  0x7f   : > { %p949_p8 = pnand %p948_p4, %p944_p7 }
  0x81   : > { %952 = shalt.err (!%p949_p8)
}
  0x82   : > { %822 = dma.vmem_to_hbm [thread:$0]  (%p1427_p13), %s1360_s14, 8192, %s1358_s19, %s702_s21  }
  0x83 PF: > { %p839_p10 = scmp.ge.s32.totalorder %s995_s12, 2  ;;  %s728_s6 = sand.u32 1, %s983_s9  }
  0x84   : > { %p1428_p12 = scmp.ne.s32.totalorder %s1416_s16, 0  ;;  %s729_s8 = scalar_lea.sflag [#allocation4], %s728_s6 }
  0x86   : > { %p833_p1 = pnand %p839_p10, %p1428_p12 }
  0x88   : > { %p834_p2 = pneg %p833_p1 }
  0x8a   : > { %978 = dma.done.wait (%p834_p2), %s729_s8, 8192  }
  0x8b   : > { %980 = vsyncadd (%p834_p2), %s729_s8, 4294959104  ;;  %p16_p0 = scmp.ge.s32.totalorder %s1062_s20, 6   ;;  %s1429_s9 = smov %s987_s10 }
  0x8c   : > { %s1430_s10 = smov %s991_s11  ;;  %s1431_s11 = smov %s1089_s28 }
  0x8d   : > { %s1432_s12 = smov %s1062_s20  ;;  %18 = sbr.rel (!%p16_p0) target bundleno = 6 (0x6), region = 78 }
  0x92   :  { %734 = vsyncpa [#allocation3], 1 }
  0x93   :  { %736 = vsyncpa [#allocation3 + $0x1], 1 }
  0x94   :  { %737 = vsyncpa [#allocation6], 1 }
  0x95   :  { %739 = vsyncpa [#allocation6 + $0x1], 1 }
  0x96   :  { %740 = vsyncpa [#allocation4], 1 }
  0x97   :  { %742 = vsyncpa [#allocation4 + $0x1], 1 }

</bundles_post_ra>
